<compile_context>
chip_gen: v7x
topology: tpu7x:2x2x1
jax: 0.10.0
libtpu: 0.0.40
codegen_flags: <defaults>
</compile_context>

<pallas_src>
import functools

import jax
import jax.numpy as jnp
from jax.experimental import pallas as pl
from jax.experimental.pallas import tpu as pltpu


def _row_linear_kernel(x_ref, w_ref, b_ref, o_ref, acc_ref):
    """x_ref: (tm, tk), w_ref: (tk, tn) (pre-transposed), b_ref: (1, tn),
    o_ref: (tm, tn), acc_ref: (tm, tn) f32 scratch persisting over the K axis."""
    k = pl.program_id(2)

    @pl.when(k == 0)
    def _():
        acc_ref[...] = jnp.zeros_like(acc_ref)

    # Weight is already (K, N): no in-kernel transpose, MXU-friendly contraction.
    acc_ref[...] += jnp.dot(
        x_ref[...], w_ref[...], preferred_element_type=jnp.float32
    )

    # Bias add + dtype cast + store only once per (i, j) output tile.
    @pl.when(k == pl.num_programs(2) - 1)
    def _():
        o_ref[...] = (acc_ref[...] + b_ref[...].astype(jnp.float32)).astype(
            o_ref.dtype
        )


def _round_up(x, m):
    return (x + m - 1) // m * m


def tensor_parallel_row_linear_forward(
    x, weight, bias=None, *, tm=256, tn=512, tk=512
):
    """Per-shard forward: y = x @ weight.T + bias.

    x:      (..., in_features)            [in_features = this shard's K slice]
    weight: (out_features, in_features)   [PyTorch nn.Linear layout]
    bias:   (out_features,) or None       [only rank 0 holds a bias in TP]
    """
    leading = x.shape[:-1]
    N, K = weight.shape
    x2d = x.reshape(-1, K)
    M = x2d.shape[0]

    # Clip tile sizes to the (padded) problem; keep (8, 128) layout alignment
    # and lane-dense (multiple-of-128) output tiles.
    tm = min(tm, _round_up(M, 8))
    tn = min(tn, _round_up(N, 128))
    tk = min(tk, _round_up(K, 128))

    Mp, Np, Kp = _round_up(M, tm), _round_up(N, tn), _round_up(K, tk)

    # Pre-transpose the weight once in the wrapper: (K, N) makes the lane dim
    # the output dim (lane-dense DMA tiles) and removes the in-kernel w.T.
    w_t = weight.T  # (K, N)

    x_p = jnp.pad(x2d, ((0, Mp - M), (0, Kp - K)))
    w_p = jnp.pad(w_t, ((0, Kp - K), (0, Np - N)))
    if bias is None:
        b_p = jnp.zeros((1, Np), dtype=x.dtype)
    else:
        b_p = jnp.pad(bias.reshape(1, N).astype(x.dtype), ((0, 0), (0, Np - N)))

    grid = (Mp // tm, Np // tn, Kp // tk)

    flops = 2 * Mp * Np * Kp
    bytes_accessed = (
        x_p.size * x_p.dtype.itemsize
        + w_p.size * w_p.dtype.itemsize
        + Mp * Np * x.dtype.itemsize
    )

    out = pl.pallas_call(
        _row_linear_kernel,
        out_shape=jax.ShapeDtypeStruct((Mp, Np), x.dtype),
        grid_spec=pltpu.PrefetchScalarGridSpec(
            num_scalar_prefetch=0,
            grid=grid,
            in_specs=[
                pl.BlockSpec((tm, tk), lambda i, j, k: (i, k)),  # activations
                pl.BlockSpec((tk, tn), lambda i, j, k: (k, j)),  # weight (K, N)
                pl.BlockSpec((1, tn), lambda i, j, k: (0, j)),   # bias
            ],
            out_specs=pl.BlockSpec((tm, tn), lambda i, j, k: (i, j)),
            scratch_shapes=[pltpu.VMEM((tm, tn), jnp.float32)],
        ),
        compiler_params=pltpu.CompilerParams(
            # M, N independent (megacore / 2-TC sharding on v7x); K is the
            # reduction axis carried by the VMEM accumulator.
            dimension_semantics=("parallel", "parallel", "arbitrary"),
            vmem_limit_bytes=48 * 1024 * 1024,
        ),
        cost_estimate=pl.CostEstimate(
            flops=flops, transcendentals=0, bytes_accessed=bytes_accessed
        ),
    )(x_p, w_p, b_p)

    out = out[:M, :N].reshape(*leading, N)
    # TODO(synk): TP all-reduce of the partial sums across the process group
    # (jax.lax.psum under shard_map); identity on a single shard.
    return out


if __name__ == "__main__":
    key = jax.random.PRNGKey(0)
    k_x, k_w, k_b = jax.random.split(key, 3)

    batch, seq, hidden, out_features = 2, 8, 32, 64

    x = jax.random.normal(k_x, (batch, seq, hidden), dtype=jnp.float32)
    weight = jax.random.normal(k_w, (out_features, hidden), dtype=jnp.float32) * 0.02
    bias = jax.random.normal(k_b, (out_features,), dtype=jnp.float32) * 0.01

    fwd = jax.jit(functools.partial(tensor_parallel_row_linear_forward))
    y = fwd(x, weight, bias)
    y = jax.block_until_ready(y)

    # Reference check (plain JAX) — matches F.linear(x, weight, bias) followed
    # by a single-shard (no-op) all-reduce.
    y_ref = x @ weight.T + bias
    assert y.shape == (batch, seq, out_features)
    assert jnp.allclose(y, y_ref, atol=1e-5, rtol=1e-5)

    # Also exercise the bias=None path (non-zero TP ranks hold no bias).
    y_nb = jax.block_until_ready(tensor_parallel_row_linear_forward(x, weight, None))
    assert jnp.allclose(y_nb, x @ weight.T, atol=1e-5, rtol=1e-5)

    print("KERNEL_OK")
</pallas_src>

<mosaic_0001>
module attributes {stable_mosaic.version = 11 : i64} {
  func.func @_row_linear_kernel(%arg0: i32, %arg1: i32, %arg2: i32, %arg3: memref<16x128xf32, #tpu.memory_space<vmem>>, %arg4: memref<128x128xf32, #tpu.memory_space<vmem>>, %arg5: memref<1x128xf32, #tpu.memory_space<vmem>>, %arg6: memref<16x128xf32, #tpu.memory_space<vmem>>, %arg7: memref<16x128xf32, #tpu.memory_space<vmem>>) attributes {dimension_semantics = [#tpu.dimension_semantics<parallel>, #tpu.dimension_semantics<parallel>, #tpu.dimension_semantics<arbitrary>], iteration_bounds = array<i64: 1, 1, 1>, scalar_prefetch = 0 : i64, scratch_operands = 1 : i64, tpu.core_type = #tpu.core_type<tc>, window_params = [{transform_indices = @transform_0, window_bounds = array<i64: 16, 128>}, {transform_indices = @transform_1, window_bounds = array<i64: 128, 128>}, {transform_indices = @transform_2, window_bounds = array<i64: 1, 128>}, {transform_indices = @transform_3, window_bounds = array<i64: 16, 128>}]} {
    %c0_i32 = arith.constant 0 : i32
    %0 = arith.cmpi eq, %arg2, %c0_i32 : i32
    %1 = arith.extui %0 : i1 to i32
    %c0_i32_0 = arith.constant 0 : i32
    %2 = arith.cmpi ne, %1, %c0_i32_0 : i32
    scf.if %2 {
      %cst_10 = arith.constant 0.000000e+00 : f32
      %12 = vector.broadcast %cst_10 : f32 to vector<16x128xf32>
      %c0_11 = arith.constant 0 : index
      %c0_12 = arith.constant 0 : index
      %13 = vector.load %arg7[%c0_11, %c0_12] : memref<16x128xf32, #tpu.memory_space<vmem>>, vector<16x128xf32>
      tpu.vector_store %arg7[%c0_11, %c0_12], %12 {strides = array<i32>} : memref<16x128xf32, #tpu.memory_space<vmem>>, vector<16x128xf32>,
    } else {
    }
    %c0 = arith.constant 0 : index
    %c0_1 = arith.constant 0 : index
    %3 = vector.load %arg7[%c0, %c0_1] : memref<16x128xf32, #tpu.memory_space<vmem>>, vector<16x128xf32>
    %c0_2 = arith.constant 0 : index
    %c0_3 = arith.constant 0 : index
    %4 = vector.load %arg3[%c0_2, %c0_3] : memref<16x128xf32, #tpu.memory_space<vmem>>, vector<16x128xf32>
    %c0_4 = arith.constant 0 : index
    %c0_5 = arith.constant 0 : index
    %5 = vector.load %arg4[%c0_4, %c0_5] : memref<128x128xf32, #tpu.memory_space<vmem>>, vector<128x128xf32>
    %cst = arith.constant dense<0.000000e+00> : vector<16x128xf32>
    %6 = tpu.matmul %4, %5, %cst {dimension_numbers = #tpu.dot_dimension_numbers<[1], [0], [0], [1], [0, 0, 1, 1], [], []>} : vector<16x128xf32>, vector<128x128xf32>, vector<16x128xf32> -> vector<16x128xf32>
    %7 = arith.addf %3, %6 : vector<16x128xf32>
    %c0_6 = arith.constant 0 : index
    %c0_7 = arith.constant 0 : index
    %8 = vector.load %arg7[%c0_6, %c0_7] : memref<16x128xf32, #tpu.memory_space<vmem>>, vector<16x128xf32>
    tpu.vector_store %arg7[%c0_6, %c0_7], %7 {strides = array<i32>} : memref<16x128xf32, #tpu.memory_space<vmem>>, vector<16x128xf32>,
    %c0_i32_8 = arith.constant 0 : i32
    %9 = arith.cmpi eq, %arg2, %c0_i32_8 : i32
    %10 = arith.extui %9 : i1 to i32
    %c0_i32_9 = arith.constant 0 : i32
    %11 = arith.cmpi ne, %10, %c0_i32_9 : i32
    scf.if %11 {
      %c0_10 = arith.constant 0 : index
      %c0_11 = arith.constant 0 : index
      %12 = vector.load %arg7[%c0_10, %c0_11] : memref<16x128xf32, #tpu.memory_space<vmem>>, vector<16x128xf32>
      %c0_12 = arith.constant 0 : index
      %c0_13 = arith.constant 0 : index
      %13 = vector.load %arg5[%c0_12, %c0_13] : memref<1x128xf32, #tpu.memory_space<vmem>>, vector<1x128xf32>
      %14 = vector.broadcast %13 : vector<1x128xf32> to vector<16x128xf32>
      %15 = arith.addf %12, %14 : vector<16x128xf32>
      %c0_14 = arith.constant 0 : index
      %c0_15 = arith.constant 0 : index
      %16 = vector.load %arg6[%c0_14, %c0_15] : memref<16x128xf32, #tpu.memory_space<vmem>>, vector<16x128xf32>
      tpu.vector_store %arg6[%c0_14, %c0_15], %15 {strides = array<i32>} : memref<16x128xf32, #tpu.memory_space<vmem>>, vector<16x128xf32>,
    } else {
    }
    return
  }
  func.func @transform_0(%arg0: i32, %arg1: i32, %arg2: i32) -> (i32, i32) {
    %c0_i32 = arith.constant 0 : i32
    return %arg0, %arg2 : i32, i32
  }
  func.func @transform_1(%arg0: i32, %arg1: i32, %arg2: i32) -> (i32, i32) {
    %c0_i32 = arith.constant 0 : i32
    return %arg2, %arg1 : i32, i32
  }
  func.func @transform_2(%arg0: i32, %arg1: i32, %arg2: i32) -> (i32, i32) {
    %c0_i32 = arith.constant 0 : i32
    %c0_i32_0 = arith.constant 0 : i32
    return %c0_i32, %arg1 : i32, i32
  }
  func.func @transform_3(%arg0: i32, %arg1: i32, %arg2: i32) -> (i32, i32) {
    %c0_i32 = arith.constant 0 : i32
    return %arg0, %arg1 : i32, i32
  }
}

</mosaic_0001>

<bundles_post_ra>
// kernel: tensor_parallel_row_linear_forward.1
= control target key start
LH: loop header
LB: loop body
LE: loop exit
PB: predicated region body
PF: predicated region fallthrough
CT: control target
= control target key end

     0   :  { %s308_s1 = inlined_call_operand.vmem [shape: f32[128,128], index: 1, kind: input, shape index: {}]   ;;  %s309_s0 = inlined_call_operand.vmem [shape: f32[16,128], index: 0, kind: input, shape index: {}]   ;;  %s310_s2 = inlined_call_operand.vmem [shape: f32[1,128], index: 2, kind: input, shape index: {}]   ;;  %s311_s3 = inlined_call_operand.vmem [shape: f32[16,128], index: 3, kind: output, shape index: {}]  }
   0x1   :  { %v24_v0 = vld [vmem:[%s308_s1] sm:$0xff]  ;;  %v25_v1 = vld [vmem:[%s308_s1 + $0x8] sm:$0xff]  ;;  %v26_v2 = vld [vmem:[%s308_s1 + $0x10] sm:$0xff] }
   0x2   :  { %v193_v3 = vpack.c.bf16 %v25_v1, %v24_v0  ;;  %v27_v4 = vld [vmem:[%s308_s1 + $0x18] sm:$0xff]  ;;  %v28_v6 = vld [vmem:[%s308_s1 + $0x20] sm:$0xff]  ;;  %v29_v7 = vld [vmem:[%s308_s1 + $0x28] sm:$0xff] }
   0x3   :  { %v197_v5 = vpack.c.bf16 %v27_v4, %v26_v2  ;;  %v201_v8 = vpack.c.bf16 %v29_v7, %v28_v6  ;;  %v22_v9 = vld [vmem:[%s309_s0] sm:$0xff]  ;;  %v30_v10 = vld [vmem:[%s308_s1 + $0x30] sm:$0xff]  ;;  %v31_v11 = vld [vmem:[%s308_s1 + $0x38] sm:$0xff] }
   0x4   :  { %194 = vmatprep.subr.bf16.mxu0 %v193_v3  ;;  %190 = vmatprep.mubr.f32.mxu0 %v22_v9  ;;  %v205_v12 = vpack.c.bf16 %v31_v11, %v30_v10  ;;  %v32_v13 = vld [vmem:[%s308_s1 + $0x40] sm:$0xff]  ;;  %v33_v14 = vld [vmem:[%s308_s1 + $0x48] sm:$0xff]  ;;  %v34_v16 = vld [vmem:[%s308_s1 + $0x50] sm:$0xff] }
   0x5   :  { %196 = vmatpush3.bf16.msra.mxu0 %v193_v3  ;;  %v209_v15 = vpack.c.bf16 %v33_v14, %v32_v13  ;;  %v35_v17 = vld [vmem:[%s308_s1 + $0x58] sm:$0xff]  ;;  %v36_v19 = vld [vmem:[%s308_s1 + $0x60] sm:$0xff]  ;;  %v37_v20 = vld [vmem:[%s308_s1 + $0x68] sm:$0xff] }
   0x6   :  { %198 = vmatprep.subr.bf16.mxu0 %v197_v5  ;;  %v213_v18 = vpack.c.bf16 %v35_v17, %v34_v16  ;;  %v217_v21 = vpack.c.bf16 %v37_v20, %v36_v19  ;;  %v38_v22 = vld [vmem:[%s308_s1 + $0x70] sm:$0xff]  ;;  %v39_v23 = vld [vmem:[%s308_s1 + $0x78] sm:$0xff]  ;;  %v23_v25 = vld [vmem:[%s309_s0 + $0x8] sm:$0xff] }
   0x7   :  { %v221_v24 = vpack.c.bf16 %v39_v23, %v38_v22  ;;  %v139_v26 = vld [vmem:[%s310_s2] ss:$0 sm:$0xff] }
   0x9   :  { %200 = vmatpush3.bf16.msra.mxu0 %v197_v5 }
   0xa   :  { %202 = vmatprep.subr.bf16.mxu0 %v201_v8 }
   0xd   :  { %204 = vmatpush3.bf16.msra.mxu0 %v201_v8 }
   0xe   :  { %206 = vmatprep.subr.bf16.mxu0 %v205_v12 }
  0x11   :  { %208 = vmatpush3.bf16.msra.mxu0 %v205_v12 }
  0x12   :  { %210 = vmatprep.subr.bf16.mxu0 %v209_v15 }
  0x15   :  { %212 = vmatpush3.bf16.msra.mxu0 %v209_v15 }
  0x16   :  { %214 = vmatprep.subr.bf16.mxu0 %v213_v18 }
  0x19   :  { %216 = vmatpush3.bf16.msra.mxu0 %v213_v18 }
  0x1a   :  { %218 = vmatprep.subr.bf16.mxu0 %v217_v21 }
  0x1d   :  { %220 = vmatpush3.bf16.msra.mxu0 %v217_v21 }
  0x1e   :  { %222 = vmatprep.subr.bf16.mxu0 %v221_v24 }
  0x21   :  { %224 = vmatpush3.bf16.msra.mxu0 %v221_v24 }
  0x24   :  { %191 = vmatmul.mubr.f32.vlgmr.msra.gmra.mrb[0].mxu0 %v23_v25 }
  0xf7   :  { %v192_v27 = vpop.f32.mrb[0].mxu0 }
  0xf8   :  { %v132_v28 = vadd.f32 %v192_v27, %v139_v26  ;;  %v106_v29 = vpop.f32.mrb[1].mxu0 }
  0xf9   :  { %v131_v30 = vadd.f32 %v139_v26, %v106_v29 }
  0xfa   :  { %134 = vst [vmem:[%s311_s3 + $0x8] sm:$0xff] %v132_v28 }
  0xfb   :  { %133 = vst [vmem:[%s311_s3] sm:$0xff] %v131_v30 }

</bundles_post_ra>
